<compile_context>
chip_gen: v5e
topology: v5e:2x2
jax: 0.10.0
libtpu: 0.0.40
codegen_flags: <defaults>
</compile_context>

<pallas_src>
import functools

import jax
import jax.numpy as jnp
from jax.experimental import pallas as pl
from jax.experimental.pallas import tpu as pltpu

IN_FEATURES = 900
NUM_CLASSES = 300          # `weight` in the PyTorch script

K_PAD = 1024               # 900 -> 8 * 128  (MXU / lane aligned reduction dim)
N_PAD = 384                # 300 -> 3 * 128  (lane-dense output stores)


def _round_up(x, m):
    return (x + m - 1) // m * m


def linear_kernel(x_ref, w_ref, b_ref, o_ref):
    # x_ref: [TM, 1024] bf16   w_ref: [1024, 384] bf16
    # b_ref: [1, 384]  f32     o_ref: [TM, 384]   f32
    acc = jnp.dot(x_ref[...], w_ref[...], preferred_element_type=jnp.float32)
    o_ref[...] = acc + b_ref[...]


def init_params(key):
    # Mimic PyTorch nn.Linear default init: U(-1/sqrt(fan_in), 1/sqrt(fan_in)).
    kw, kb = jax.random.split(key)
    bound = 1.0 / jnp.sqrt(jnp.float32(IN_FEATURES))
    # PyTorch weight is [out, in]; store transposed [in, out] for x @ W_t.
    w = jax.random.uniform(kw, (NUM_CLASSES, IN_FEATURES), jnp.float32, -bound, bound)
    b = jax.random.uniform(kb, (NUM_CLASSES,), jnp.float32, -bound, bound)
    return jnp.asarray(w.T), b        # [900, 300], [300]


def prepare_params(w_t, b):
    """One-time padding to MXU/lane-aligned shapes; weight in bf16, bias in f32."""
    w_pad = jnp.zeros((K_PAD, N_PAD), jnp.float32)
    w_pad = w_pad.at[:IN_FEATURES, :NUM_CLASSES].set(w_t.astype(jnp.float32))
    b_pad = jnp.zeros((1, N_PAD), jnp.float32)
    b_pad = b_pad.at[0, :NUM_CLASSES].set(b.astype(jnp.float32))
    return w_pad.astype(jnp.bfloat16), b_pad


@functools.partial(jax.jit, donate_argnums=())
def net_forward(x, w_pad, b_pad):
    """x: [batch, ...] flattening to 900 features; returns [batch, 300] f32."""
    batch = x.shape[0]
    x2d = x.reshape(batch, -1).astype(jnp.float32)
    assert x2d.shape[1] == IN_FEATURES, (
        f"expected {IN_FEATURES} features, got {x2d.shape[1]}")

    # Pad batch to at least one sublane tile (8) and to a multiple of TM;
    # pad the feature dim to K_PAD. Padded rows/cols are zero so the valid
    # region of the output is unchanged.
    m_pad = max(8, _round_up(batch, 8))
    tm = 256 if m_pad >= 256 else m_pad
    m_pad = _round_up(m_pad, tm)

    x_pad = jnp.zeros((m_pad, K_PAD), jnp.float32)
    x_pad = x_pad.at[:batch, :IN_FEATURES].set(x2d)
    x_bf16 = x_pad.astype(jnp.bfloat16)

    grid = (m_pad // tm,)
    flops = 2 * m_pad * K_PAD * N_PAD
    bytes_accessed = (m_pad * K_PAD * 2        # x (bf16)
                      + K_PAD * N_PAD * 2      # W (bf16)
                      + N_PAD * 4              # bias (f32)
                      + m_pad * N_PAD * 4)     # y (f32)

    out_pad = pl.pallas_call(
        linear_kernel,
        out_shape=jax.ShapeDtypeStruct((m_pad, N_PAD), jnp.float32),
        grid_spec=pl.GridSpec(
            grid=grid,
            in_specs=[
                pl.BlockSpec((tm, K_PAD), lambda i: (i, 0)),      # x tile
                pl.BlockSpec((K_PAD, N_PAD), lambda i: (0, 0)),   # W resident
                pl.BlockSpec((1, N_PAD), lambda i: (0, 0)),       # bias resident
            ],
            out_specs=pl.BlockSpec((tm, N_PAD), lambda i: (i, 0)),
        ),
        compiler_params=pltpu.CompilerParams(
            dimension_semantics=("parallel",),
        ),
        cost_estimate=pl.CostEstimate(
            flops=flops, transcendentals=0, bytes_accessed=bytes_accessed),
    )(x_bf16, w_pad, b_pad)

    # Slice away the batch / class padding.
    return out_pad[:batch, :NUM_CLASSES]


if __name__ == "__main__":
    key = jax.random.PRNGKey(0)
    k_x, k_p = jax.random.split(key)

    # Input consistent with forward(): anything that flattens to 900 features.
    batch = 2
    x = jax.random.normal(k_x, (batch, 30, 30), dtype=jnp.float32)

    w_t, b = init_params(k_p)
    w_pad, b_pad = prepare_params(w_t, b)

    out = jax.block_until_ready(net_forward(x, w_pad, b_pad))
    assert out.shape == (batch, NUM_CLASSES)

    x2d = x.reshape(batch, -1)

    # Reference with the same bf16 input quantization (tight tolerance).
    ref_bf16 = jnp.dot(x2d.astype(jnp.bfloat16), w_t.astype(jnp.bfloat16),
                       preferred_element_type=jnp.float32) + b[None, :]
    assert jnp.allclose(out, ref_bf16, atol=1e-3, rtol=1e-3)

    # Full-f32 reference (loose tolerance accounting for bf16 input rounding).
    ref_f32 = x2d @ w_t + b[None, :]
    assert jnp.allclose(out, ref_f32, atol=5e-2, rtol=5e-2)

    print("KERNEL_OK")
</pallas_src>

<mosaic_0001>
module attributes {stable_mosaic.version = 11 : i64} {
  func.func @linear_kernel(%arg0: i32, %arg1: memref<8x1024xbf16, #tpu.memory_space<vmem>>, %arg2: memref<1024x384xbf16, #tpu.memory_space<vmem>>, %arg3: memref<1x384xf32, #tpu.memory_space<vmem>>, %arg4: memref<8x384xf32, #tpu.memory_space<vmem>>) attributes {dimension_semantics = [#tpu.dimension_semantics<parallel>], iteration_bounds = array<i64: 1>, scalar_prefetch = 0 : i64, scratch_operands = 0 : i64, tpu.core_type = #tpu.core_type<tc>, window_params = [{transform_indices = @transform_0, window_bounds = array<i64: 8, 1024>}, {pipeline_mode = #tpu.pipeline_mode<synchronous>, transform_indices = @transform_1, window_bounds = array<i64: 1024, 384>}, {pipeline_mode = #tpu.pipeline_mode<synchronous>, transform_indices = @transform_2, window_bounds = array<i64: 1, 384>}, {transform_indices = @transform_3, window_bounds = array<i64: 8, 384>}]} {
    %c0 = arith.constant 0 : index
    %c0_0 = arith.constant 0 : index
    %0 = vector.load %arg1[%c0, %c0_0] : memref<8x1024xbf16, #tpu.memory_space<vmem>>, vector<8x1024xbf16>
    %c0_1 = arith.constant 0 : index
    %c0_2 = arith.constant 0 : index
    %1 = vector.load %arg2[%c0_1, %c0_2] : memref<1024x384xbf16, #tpu.memory_space<vmem>>, vector<1024x384xbf16>
    %cst = arith.constant dense<0.000000e+00> : vector<8x384xf32>
    %2 = tpu.matmul %0, %1, %cst {dimension_numbers = #tpu.dot_dimension_numbers<[1], [0], [0], [1], [0, 0, 1, 1], [], []>} : vector<8x1024xbf16>, vector<1024x384xbf16>, vector<8x384xf32> -> vector<8x384xf32>
    %c0_3 = arith.constant 0 : index
    %c0_4 = arith.constant 0 : index
    %3 = vector.load %arg3[%c0_3, %c0_4] : memref<1x384xf32, #tpu.memory_space<vmem>>, vector<1x384xf32>
    %4 = vector.broadcast %3 : vector<1x384xf32> to vector<8x384xf32>
    %5 = arith.addf %2, %4 : vector<8x384xf32>
    %c0_5 = arith.constant 0 : index
    %c0_6 = arith.constant 0 : index
    %6 = vector.load %arg4[%c0_5, %c0_6] : memref<8x384xf32, #tpu.memory_space<vmem>>, vector<8x384xf32>
    tpu.vector_store %arg4[%c0_5, %c0_6], %5 {strides = array<i32>} : memref<8x384xf32, #tpu.memory_space<vmem>>, vector<8x384xf32>,
    return
  }
  func.func @transform_0(%arg0: i32) -> (i32, i32) {
    %c0_i32 = arith.constant 0 : i32
    %c0_i32_0 = arith.constant 0 : i32
    return %arg0, %c0_i32 : i32, i32
  }
  func.func @transform_1(%arg0: i32) -> (i32, i32) {
    %c0_i32 = arith.constant 0 : i32
    %c0_i32_0 = arith.constant 0 : i32
    %c0_i32_1 = arith.constant 0 : i32
    return %c0_i32, %c0_i32_0 : i32, i32
  }
  func.func @transform_2(%arg0: i32) -> (i32, i32) {
    %c0_i32 = arith.constant 0 : i32
    %c0_i32_0 = arith.constant 0 : i32
    %c0_i32_1 = arith.constant 0 : i32
    return %c0_i32, %c0_i32_0 : i32, i32
  }
  func.func @transform_3(%arg0: i32) -> (i32, i32) {
    %c0_i32 = arith.constant 0 : i32
    %c0_i32_0 = arith.constant 0 : i32
    return %arg0, %c0_i32 : i32, i32
  }
}

</mosaic_0001>

<bundles_post_ra>
// kernel: net_forward.1
= control target key start
LH: loop header
LB: loop body
LE: loop exit
PB: predicated region body
PF: predicated region fallthrough
CT: control target
= control target key end

     0   :  { %8 = vsyncpa [#allocation3], 0  ;;  %s2659_s15 = smov [#allocation2]   ;;  %s2660_s17 = smov 192   ;;  %s2754_s0 = inlined_call_operand.vmem [shape: bf16[8,1024], index: 0, kind: input, shape index: {}]   ;;  %s2755_s1 = inlined_call_operand.hbm [shape: bf16[1024,384], index: 1, kind: input, shape index: {}]   ;;  %s2756_s2 = inlined_call_operand.vmem [shape: f32[1,384], index: 2, kind: input, shape index: {}]   ;;  %s2757_s3 = inlined_call_operand.vmem [shape: f32[8,384], index: 3, kind: output, shape index: {}]  }
   0x1   :  { %s15_s14 = sshll.u32 %s2755_s1, 4  ;;  %s17_s16 = sshll.u32 %s2659_s15, 4  ;;  %s16_s14 = int_to_ptr.hbm [resolvable:$true] %s15_s14  ;;  %s18_s16 = int_to_ptr.vmem [resolvable:$true] %s17_s16 }
   0x2   :  { %s2661_s18 = smov 12  }
   0x3   :  { %23 = dma.hbm_to_vmem [thread:$0]  %s16_s14, 24576, %s18_s16, [#allocation3], %s2660_s17, %s2660_s17, %s2661_s18  }
   0x4   :  { %2657 = dma.done.wait [#allocation3], 24576  }
   0x5   :  { %2658 = vsyncadd [#allocation3], 4294942720  ;;  %v1756_v0 = vld [vmem:[#allocation2 + $0xa8] sm:$0xf]  ;;  %v2460_v1 = vld [vmem:[#allocation2 + $0xb0] sm:$0xf0] }
   0x6   :  { %v1852_v2 = vld [vmem:[#allocation2 + $0x168] sm:$0xf]  ;;  %v1757_v3 = vor.u32 %v2460_v1, %v1756_v0  ;;  %v2484_v4 = vld [vmem:[#allocation2 + $0x170] sm:$0xf0]  ;;  %v1744_v11 = vld [vmem:[#allocation2 + $0x90] sm:$0xf] }
   0x7   :  { %v1948_v5 = vld [vmem:[#allocation2 + $0x228] sm:$0xf]  ;;  %v2508_v6 = vld [vmem:[#allocation2 + $0x230] sm:$0xf0]  ;;  %v1853_v7 = vor.u32 %v2484_v4, %v1852_v2  ;;  %v2457_v13 = vld [vmem:[#allocation2 + $0x98] sm:$0xf0] }
   0x8   :  { %v1949_v8 = vor.u32 %v2508_v6, %v1948_v5  ;;  %v2044_v9 = vld [vmem:[#allocation2 + $0x2e8] sm:$0xf]  ;;  %v2532_v10 = vld [vmem:[#allocation2 + $0x2f0] sm:$0xf0]  ;;  %1350 = vmatpush.bf16.msra.mxu0 %v1757_v3  ;;  %v1840_v14 = vld [vmem:[#allocation2 + $0x150] sm:$0xf]  ;;  %v1745_v16 = vor.u32 %v2457_v13, %v1744_v11 }
   0x9   :  { %v2045_v12 = vor.u32 %v2532_v10, %v2044_v9  ;;  %v2481_v15 = vld [vmem:[#allocation2 + $0x158] sm:$0xf0]  ;;  %1363 = vmatpush.bf16.msra.mxu1 %v1853_v7  ;;  %v1936_v18 = vld [vmem:[#allocation2 + $0x210] sm:$0xf]  ;;  %v1732_v23 = vld [vmem:[#allocation2 + $0x78] sm:$0xf] }
   0xa   :  { %1376 = vmatpush.bf16.msra.mxu2 %v1949_v8  ;;  %v1841_v17 = vor.u32 %v2481_v15, %v1840_v14  ;;  %v2505_v19 = vld [vmem:[#allocation2 + $0x218] sm:$0xf0]  ;;  %v2032_v20 = vld [vmem:[#allocation2 + $0x2d0] sm:$0xf]  ;;  %v2454_v24 = vld [vmem:[#allocation2 + $0x80] sm:$0xf0] }
   0xb   :  { %1389 = vmatpush.bf16.msra.mxu3 %v2045_v12  ;;  %v1937_v21 = vor.u32 %v2505_v19, %v1936_v18  ;;  %v2529_v22 = vld [vmem:[#allocation2 + $0x2d8] sm:$0xf0]  ;;  %v1828_v26 = vld [vmem:[#allocation2 + $0x138] sm:$0xf]  ;;  %v2478_v27 = vld [vmem:[#allocation2 + $0x140] sm:$0xf0]  ;;  %v1733_v29 = vor.u32 %v2454_v24, %v1732_v23 }
   0xc   :  { %v2033_v25 = vor.u32 %v2529_v22, %v2032_v20  ;;  %v1924_v28 = vld [vmem:[#allocation2 + $0x1f8] sm:$0xf]  ;;  %1351 = vmatpush.bf16.msra.mxu0 %v1745_v16  ;;  %v2502_v30 = vld [vmem:[#allocation2 + $0x200] sm:$0xf0]  ;;  %v1829_v33 = vor.u32 %v2478_v27, %v1828_v26  ;;  %v1720_v35 = vld [vmem:[#allocation2 + $0x60] sm:$0xf] }
   0xd   :  { %v2020_v31 = vld [vmem:[#allocation2 + $0x2b8] sm:$0xf]  ;;  %v2526_v32 = vld [vmem:[#allocation2 + $0x2c0] sm:$0xf0]  ;;  %1364 = vmatpush.bf16.msra.mxu1 %v1841_v17  ;;  %v1925_v34 = vor.u32 %v2502_v30, %v1924_v28  ;;  %v2451_v36 = vld [vmem:[#allocation2 + $0x68] sm:$0xf0] }
   0xe   :  { %1377 = vmatpush.bf16.msra.mxu2 %v1937_v21  ;;  %v1816_v37 = vld [vmem:[#allocation2 + $0x120] sm:$0xf]  ;;  %v2021_v38 = vor.u32 %v2526_v32, %v2020_v31  ;;  %v2475_v39 = vld [vmem:[#allocation2 + $0x128] sm:$0xf0]  ;;  %v1721_v44 = vor.u32 %v2451_v36, %v1720_v35  ;;  %v1708_v47 = vld [vmem:[#allocation2 + $0x48] sm:$0xf] }
   0xf   :  { %1390 = vmatpush.bf16.msra.mxu3 %v2033_v25  ;;  %v1912_v40 = vld [vmem:[#allocation2 + $0x1e0] sm:$0xf]  ;;  %v2499_v41 = vld [vmem:[#allocation2 + $0x1e8] sm:$0xf0]  ;;  %v1817_v45 = vor.u32 %v2475_v39, %v1816_v37  ;;  %v2448_v48 = vld [vmem:[#allocation2 + $0x50] sm:$0xf0] }
  0x10   :  { %v2008_v42 = vld [vmem:[#allocation2 + $0x2a0] sm:$0xf]  ;;  %v2523_v43 = vld [vmem:[#allocation2 + $0x2a8] sm:$0xf0]  ;;  %1352 = vmatpush.bf16.msra.mxu0 %v1733_v29  ;;  %v1913_v46 = vor.u32 %v2499_v41, %v1912_v40  ;;  %v1804_v49 = vld [vmem:[#allocation2 + $0x108] sm:$0xf]  ;;  %v1709_v56 = vor.u32 %v2448_v48, %v1708_v47 }
  0x11   :  { %1365 = vmatpush.bf16.msra.mxu1 %v1829_v33  ;;  %v2009_v50 = vor.u32 %v2523_v43, %v2008_v42  ;;  %v2472_v51 = vld [vmem:[#allocation2 + $0x110] sm:$0xf0]  ;;  %v1900_v52 = vld [vmem:[#allocation2 + $0x1c8] sm:$0xf]  ;;  %v1696_v59 = vld [vmem:[#allocation2 + $0x30] sm:$0xf] }
  0x12   :  { %1378 = vmatpush.bf16.msra.mxu2 %v1925_v34  ;;  %v2496_v53 = vld [vmem:[#allocation2 + $0x1d0] sm:$0xf0]  ;;  %v1996_v54 = vld [vmem:[#allocation2 + $0x288] sm:$0xf]  ;;  %v1805_v57 = vor.u32 %v2472_v51, %v1804_v49  ;;  %v2445_v60 = vld [vmem:[#allocation2 + $0x38] sm:$0xf0] }
  0x13   :  { %1391 = vmatpush.bf16.msra.mxu3 %v2021_v38  ;;  %v2520_v55 = vld [vmem:[#allocation2 + $0x290] sm:$0xf0]  ;;  %v1901_v58 = vor.u32 %v2496_v53, %v1900_v52  ;;  %v1792_v61 = vld [vmem:[#allocation2 + $0xf0] sm:$0xf]  ;;  %v2469_v63 = vld [vmem:[#allocation2 + $0xf8] sm:$0xf0]  ;;  %v1697_v4 = vor.u32 %v2445_v60, %v1696_v59 }
  0x14   :  { %1353 = vmatpush.bf16.msra.mxu0 %v1721_v44  ;;  %v1997_v62 = vor.u32 %v2520_v55, %v1996_v54  ;;  %v1888_v0 = vld [vmem:[#allocation2 + $0x1b0] sm:$0xf]  ;;  %v2493_v1 = vld [vmem:[#allocation2 + $0x1b8] sm:$0xf0]  ;;  %v1793_v5 = vor.u32 %v2469_v63, %v1792_v61  ;;  %v1684_v7 = vld [vmem:[#allocation2 + $0x18] sm:$0xf] }
  0x15   :  { %1366 = vmatpush.bf16.msra.mxu1 %v1817_v45  ;;  %v1984_v2 = vld [vmem:[#allocation2 + $0x270] sm:$0xf]  ;;  %v2517_v3 = vld [vmem:[#allocation2 + $0x278] sm:$0xf0]  ;;  %v1889_v6 = vor.u32 %v2493_v1, %v1888_v0  ;;  %v2442_v8 = vld [vmem:[#allocation2 + $0x20] sm:$0xf0] }
  0x16   :  { %1379 = vmatpush.bf16.msra.mxu2 %v1913_v46  ;;  %v1780_v9 = vld [vmem:[#allocation2 + $0xd8] sm:$0xf]  ;;  %v1985_v10 = vor.u32 %v2517_v3, %v1984_v2  ;;  %v2466_v11 = vld [vmem:[#allocation2 + $0xe0] sm:$0xf0]  ;;  %v1685_v16 = vor.u32 %v2442_v8, %v1684_v7  ;;  %v1672_v17 = vld [vmem:[#allocation2] sm:$0xf] }
  0x17   :  { %1392 = vmatpush.bf16.msra.mxu3 %v2009_v50  ;;  %v1876_v12 = vld [vmem:[#allocation2 + $0x198] sm:$0xf]  ;;  %v2490_v13 = vld [vmem:[#allocation2 + $0x1a0] sm:$0xf0]  ;;  %v2439_v18 = vld [vmem:[#allocation2 + $0x8] sm:$0xf0]  ;;  %v1781_v19 = vor.u32 %v2466_v11, %v1780_v9 }
  0x18   :  { %1354 = vmatpush.bf16.msra.mxu0 %v1709_v56  ;;  %v1972_v14 = vld [vmem:[#allocation2 + $0x258] sm:$0xf]  ;;  %v2514_v15 = vld [vmem:[#allocation2 + $0x260] sm:$0xf0]  ;;  %v1877_v20 = vor.u32 %v2490_v13, %v1876_v12  ;;  %v1768_v21 = vld [vmem:[#allocation2 + $0xc0] sm:$0xf]  ;;  %v1673_v31 = vor.u32 %v2439_v18, %v1672_v17 }
  0x19   :  { %1367 = vmatpush.bf16.msra.mxu1 %v1805_v57  ;;  %v2463_v22 = vld [vmem:[#allocation2 + $0xc8] sm:$0xf0]  ;;  %v1864_v23 = vld [vmem:[#allocation2 + $0x180] sm:$0xf]  ;;  %v1973_v24 = vor.u32 %v2514_v15, %v1972_v14  ;;  %v2140_v28 = vld [vmem:[#allocation2 + $0x3a8] sm:$0xf] }
  0x1a   :  { %1380 = vmatpush.bf16.msra.mxu2 %v1901_v58  ;;  %v2487_v25 = vld [vmem:[#allocation2 + $0x188] sm:$0xf0]  ;;  %v1960_v26 = vld [vmem:[#allocation2 + $0x240] sm:$0xf]  ;;  %v2556_v29 = vld [vmem:[#allocation2 + $0x3b0] sm:$0xf0]  ;;  %v1769_v35 = vor.u32 %v2463_v22, %v1768_v21 }
  0x1b   :  { %1393 = vmatpush.bf16.msra.mxu3 %v1997_v62  ;;  %v2511_v27 = vld [vmem:[#allocation2 + $0x248] sm:$0xf0]  ;;  %v2236_v30 = vld [vmem:[#allocation2 + $0x468] sm:$0xf]  ;;  %v2580_v32 = vld [vmem:[#allocation2 + $0x470] sm:$0xf0]  ;;  %v1865_v36 = vor.u32 %v2487_v25, %v1864_v23  ;;  %v2141_v40 = vor.u32 %v2556_v29, %v2140_v28 }
  0x1c   :  { %1355 = vmatpush.bf16.msra.mxu0 %v1697_v4  ;;  %v2332_v33 = vld [vmem:[#allocation2 + $0x528] sm:$0xf]  ;;  %v2604_v34 = vld [vmem:[#allocation2 + $0x530] sm:$0xf0]  ;;  %v1961_v39 = vor.u32 %v2511_v27, %v1960_v26  ;;  %v2237_v41 = vor.u32 %v2580_v32, %v2236_v30  ;;  %v2128_v43 = vld [vmem:[#allocation2 + $0x390] sm:$0xf] }
  0x1d   :  { %1368 = vmatpush.bf16.msra.mxu1 %v1793_v5  ;;  %v2428_v37 = vld [vmem:[#allocation2 + $0x5e8] sm:$0xf]  ;;  %v2628_v38 = vld [vmem:[#allocation2 + $0x5f0] sm:$0xf0]  ;;  %v2333_v42 = vor.u32 %v2604_v34, %v2332_v33  ;;  %v2553_v44 = vld [vmem:[#allocation2 + $0x398] sm:$0xf0] }
  0x1e   :  { %1381 = vmatpush.bf16.msra.mxu2 %v1889_v6  ;;  %v2224_v45 = vld [vmem:[#allocation2 + $0x450] sm:$0xf]  ;;  %v2429_v46 = vor.u32 %v2628_v38, %v2428_v37  ;;  %v2577_v47 = vld [vmem:[#allocation2 + $0x458] sm:$0xf0]  ;;  %v2129_v52 = vor.u32 %v2553_v44, %v2128_v43  ;;  %v2116_v53 = vld [vmem:[#allocation2 + $0x378] sm:$0xf] }
  0x1f   :  { %1394 = vmatpush.bf16.msra.mxu3 %v1985_v10  ;;  %v2320_v48 = vld [vmem:[#allocation2 + $0x510] sm:$0xf]  ;;  %v2601_v49 = vld [vmem:[#allocation2 + $0x518] sm:$0xf0]  ;;  %v2225_v54 = vor.u32 %v2577_v47, %v2224_v45  ;;  %v2550_v56 = vld [vmem:[#allocation2 + $0x380] sm:$0xf0] }
  0x20   :  { %1356 = vmatpush.bf16.msra.mxu0 %v1685_v16  ;;  %v2416_v50 = vld [vmem:[#allocation2 + $0x5d0] sm:$0xf]  ;;  %v2625_v51 = vld [vmem:[#allocation2 + $0x5d8] sm:$0xf0]  ;;  %v2321_v55 = vor.u32 %v2601_v49, %v2320_v48  ;;  %v2212_v57 = vld [vmem:[#allocation2 + $0x438] sm:$0xf]  ;;  %v2117_v3 = vor.u32 %v2550_v56, %v2116_v53 }
  0x21   :  { %1369 = vmatpush.bf16.msra.mxu1 %v1781_v19  ;;  %v31_v58 = vld [vmem:[%s2754_s0 + $0x8] sm:$0xff]  ;;  %v2417_v59 = vor.u32 %v2625_v51, %v2416_v50  ;;  %v2574_v60 = vld [vmem:[#allocation2 + $0x440] sm:$0xf0]  ;;  %v2308_v61 = vld [vmem:[#allocation2 + $0x4f8] sm:$0xf] }
  0x22   :  { %1382 = vmatpush.bf16.msra.mxu2 %v1877_v20  ;;  %v2598_v62 = vld [vmem:[#allocation2 + $0x500] sm:$0xf0]  ;;  %v304_v63 = vunpack.c.l.b16 %v31_v58  ;;  %v305_v0 = vunpack.c.h.b16 %v31_v58  ;;  %v2404_v1 = vld [vmem:[#allocation2 + $0x5b8] sm:$0xf]  ;;  %v2213_v7 = vor.u32 %v2574_v60, %v2212_v57  ;;  %v2104_v9 = vld [vmem:[#allocation2 + $0x360] sm:$0xf] }
  0x23   :  { %1395 = vmatpush.bf16.msra.mxu3 %v1973_v24  ;;  %v2622_v2 = vld [vmem:[#allocation2 + $0x5c0] sm:$0xf0]  ;;  %v2309_v8 = vor.u32 %v2598_v62, %v2308_v61  ;;  %v2547_v10 = vld [vmem:[#allocation2 + $0x368] sm:$0xf0]  ;;  %v2200_v11 = vld [vmem:[#allocation2 + $0x420] sm:$0xf] }
  0x24   :  { %1357 = vmatpush.bf16.msra.mxu0 %v1673_v31  ;;  %v2688_v4 = vpack.c.b16 %v304_v63, %v304_v63  ;;  %v30_v5 = vld [vmem:[%s2754_s0] sm:$0xff]  ;;  %v2693_v6 = vpack.c.b16 %v305_v0, %v305_v0  ;;  %v2405_v14 = vor.u32 %v2622_v2, %v2404_v1  ;;  %v2571_v15 = vld [vmem:[#allocation2 + $0x428] sm:$0xf0]  ;;  %v2105_v22 = vor.u32 %v2547_v10, %v2104_v9  ;;  %v2092_v25 = vld [vmem:[#allocation2 + $0x348] sm:$0xf] }
  0x25   :  { %1370 = vmatpush.bf16.msra.mxu1 %v1769_v35  ;;  %v302_v12 = vunpack.c.l.b16 %v30_v5  ;;  %v303_v13 = vunpack.c.h.b16 %v30_v5  ;;  %v2296_v16 = vld [vmem:[#allocation2 + $0x4e0] sm:$0xf]  ;;  %v2595_v17 = vld [vmem:[#allocation2 + $0x4e8] sm:$0xf0]  ;;  %v2201_v23 = vor.u32 %v2571_v15, %v2200_v11  ;;  %v2544_v26 = vld [vmem:[#allocation2 + $0x350] sm:$0xf0] }
  0x26   :  { %1383 = vmatpush.bf16.msra.mxu2 %v1865_v36  ;;  %v2392_v18 = vld [vmem:[#allocation2 + $0x5a0] sm:$0xf]  ;;  %v2619_v19 = vld [vmem:[#allocation2 + $0x5a8] sm:$0xf0]  ;;  %v2297_v24 = vor.u32 %v2595_v17, %v2296_v16  ;;  %v2188_v27 = vld [vmem:[#allocation2 + $0x408] sm:$0xf]  ;;  %v2093_v34 = vor.u32 %v2544_v26, %v2092_v25 }
  0x27   :  { %1396 = vmatpush.bf16.msra.mxu3 %v1961_v39  ;;  %v2696_v20 = vpack.c.b16 %v302_v12, %v302_v12  ;;  %v2699_v21 = vpack.c.b16 %v303_v13, %v303_v13  ;;  %v2393_v28 = vor.u32 %v2619_v19, %v2392_v18  ;;  %v2568_v29 = vld [vmem:[#allocation2 + $0x410] sm:$0xf0]  ;;  %v2284_v30 = vld [vmem:[#allocation2 + $0x4c8] sm:$0xf]  ;;  %v2080_v37 = vld [vmem:[#allocation2 + $0x330] sm:$0xf] }
  0x28   :  { %1402 = vmatpush.bf16.msrb.mxu0 %v2141_v40  ;;  %v2592_v31 = vld [vmem:[#allocation2 + $0x4d0] sm:$0xf0]  ;;  %v2380_v32 = vld [vmem:[#allocation2 + $0x588] sm:$0xf]  ;;  %v2189_v35 = vor.u32 %v2568_v29, %v2188_v27  ;;  %v2541_v38 = vld [vmem:[#allocation2 + $0x338] sm:$0xf0] }
  0x29   :  { %1415 = vmatpush.bf16.msrb.mxu1 %v2237_v41  ;;  %1384 = vmatmul.bf16.vlgmr.msra.gmra.mxu2 %v2688_v4  ;;  %v2616_v33 = vld [vmem:[#allocation2 + $0x590] sm:$0xf0]  ;;  %v2285_v36 = vor.u32 %v2592_v31, %v2284_v30  ;;  %v2176_v39 = vld [vmem:[#allocation2 + $0x3f0] sm:$0xf]  ;;  %v2565_v41 = vld [vmem:[#allocation2 + $0x3f8] sm:$0xf0] }
  0x2a   :  { %1428 = vmatpush.bf16.msrb.mxu2 %v2333_v42  ;;  %1397 = vmatmul.bf16.vlgmr.msra.gmra.mxu3 %v2693_v6  ;;  %v2381_v40 = vor.u32 %v2616_v33, %v2380_v32  ;;  %v2272_v42 = vld [vmem:[#allocation2 + $0x4b0] sm:$0xf]  ;;  %v2589_v43 = vld [vmem:[#allocation2 + $0x4b8] sm:$0xf0]  ;;  %v2177_v47 = vor.u32 %v2565_v41, %v2176_v39  ;;  %v2068_v49 = vld [vmem:[#allocation2 + $0x318] sm:$0xf] }
  0x2b   :  { %1441 = vmatpush.bf16.msrb.mxu3 %v2429_v46  ;;  %1358 = vmatmul.bf16.vlgmr.msra.gmra.mxu0 %v2696_v20  ;;  %v2368_v44 = vld [vmem:[#allocation2 + $0x570] sm:$0xf]  ;;  %v2613_v45 = vld [vmem:[#allocation2 + $0x578] sm:$0xf0]  ;;  %v2081_v46 = vor.u32 %v2541_v38, %v2080_v37  ;;  %v2273_v48 = vor.u32 %v2589_v43, %v2272_v42  ;;  %v2538_v50 = vld [vmem:[#allocation2 + $0x320] sm:$0xf0] }
  0x2c   :  { %1403 = vmatpush.bf16.msrb.mxu0 %v2129_v52  ;;  %1371 = vmatmul.bf16.vlgmr.msra.gmra.mxu1 %v2699_v21  ;;  %v2164_v51 = vld [vmem:[#allocation2 + $0x3d8] sm:$0xf]  ;;  %v2369_v52 = vor.u32 %v2613_v45, %v2368_v44  ;;  %v2562_v53 = vld [vmem:[#allocation2 + $0x3e0] sm:$0xf0]  ;;  %v2056_v58 = vld [vmem:[#allocation2 + $0x300] sm:$0xf] }
  0x2d   :  { %1416 = vmatpush.bf16.msrb.mxu1 %v2225_v54  ;;  %v2260_v54 = vld [vmem:[#allocation2 + $0x498] sm:$0xf]  ;;  %v2610_v57 = vld [vmem:[#allocation2 + $0x560] sm:$0xf0]  ;;  %v2535_v60 = vld [vmem:[#allocation2 + $0x308] sm:$0xf0]  ;;  %v2165_v63 = vor.u32 %v2562_v53, %v2164_v51 }
  0x2e   :  { %1429 = vmatpush.bf16.msrb.mxu2 %v2321_v55  ;;  %v2586_v55 = vld [vmem:[#allocation2 + $0x4a0] sm:$0xf0]  ;;  %v2356_v56 = vld [vmem:[#allocation2 + $0x558] sm:$0xf]  ;;  %v2152_v61 = vld [vmem:[#allocation2 + $0x3c0] sm:$0xf]  ;;  %v2057_v13 = vor.u32 %v2535_v60, %v2056_v58 }
  0x2f   :  { %1442 = vmatpush.bf16.msrb.mxu3 %v2417_v59  ;;  %v2069_v59 = vor.u32 %v2538_v50, %v2068_v49  ;;  %v2559_v62 = vld [vmem:[#allocation2 + $0x3c8] sm:$0xf0]  ;;  %v2261_v0 = vor.u32 %v2586_v55, %v2260_v54  ;;  %v2248_v1 = vld [vmem:[#allocation2 + $0x480] sm:$0xf]  ;;  %v2357_v5 = vor.u32 %v2610_v57, %v2356_v56  ;;  %v32_v9 = vld [vmem:[%s2754_s0 + $0x10] sm:$0xff] }
  0x30   :  { %1404 = vmatpush.bf16.msrb.mxu0 %v2117_v3  ;;  %v2583_v2 = vld [vmem:[#allocation2 + $0x488] sm:$0xf0]  ;;  %v33_v3 = vld [vmem:[%s2754_s0 + $0x18] sm:$0xff]  ;;  %v2153_v18 = vor.u32 %v2559_v62, %v2152_v61  ;;  %v2456_v31 = vld [vmem:[#allocation2 + $0x94] sm:$0xf] }
  0x31   :  { %1417 = vmatpush.bf16.msrb.mxu1 %v2213_v7  ;;  %v2344_v7 = vld [vmem:[#allocation2 + $0x540] sm:$0xf]  ;;  %v2459_v10 = vld [vmem:[#allocation2 + $0xac] sm:$0xf]  ;;  %v1758_v11 = vld [vmem:[#allocation2 + $0xb4] sm:$0xf0]  ;;  %v308_v17 = vunpack.c.l.b16 %v33_v3  ;;  %v2249_v19 = vor.u32 %v2583_v2, %v2248_v1  ;;  %v309_v25 = vunpack.c.h.b16 %v33_v3 }
  0x32   :  { %1430 = vmatpush.bf16.msrb.mxu2 %v2309_v8  ;;  %v2607_v8 = vld [vmem:[#allocation2 + $0x548] sm:$0xf0]  ;;  %v1950_v16 = vld [vmem:[#allocation2 + $0x234] sm:$0xf0]  ;;  %v1761_v27 = vor.u32 %v2459_v10, %v1758_v11  ;;  %v1746_v32 = vld [vmem:[#allocation2 + $0x9c] sm:$0xf0] }
  0x33   :  { %1443 = vmatpush.bf16.msrb.mxu3 %v2405_v14  ;;  %v2483_v12 = vld [vmem:[#allocation2 + $0x16c] sm:$0xf]  ;;  %v1854_v14 = vld [vmem:[#allocation2 + $0x174] sm:$0xf0]  ;;  %v2345_v26 = vor.u32 %v2607_v8, %v2344_v7  ;;  %v2480_v33 = vld [vmem:[#allocation2 + $0x154] sm:$0xf]  ;;  %v2709_v38 = vpack.c.b16 %v308_v17, %v308_v17  ;;  %v2713_v42 = vpack.c.b16 %v309_v25, %v309_v25  ;;  %v1749_v43 = vor.u32 %v2456_v31, %v1746_v32 }
  0x34   :  { %1405 = vmatpush.bf16.msrb.mxu0 %v2105_v22  ;;  %v2507_v15 = vld [vmem:[#allocation2 + $0x22c] sm:$0xf]  ;;  %v1857_v29 = vor.u32 %v2483_v12, %v1854_v14  ;;  %v1938_v37 = vld [vmem:[#allocation2 + $0x21c] sm:$0xf0]  ;;  %v2528_v39 = vld [vmem:[#allocation2 + $0x2d4] sm:$0xf] }
  0x35   :  { %1418 = vmatpush.bf16.msrb.mxu1 %v2201_v23  ;;  %v2531_v22 = vld [vmem:[#allocation2 + $0x2ec] sm:$0xf]  ;;  %v2046_v23 = vld [vmem:[#allocation2 + $0x2f4] sm:$0xf0]  ;;  %v1953_v30 = vor.u32 %v2507_v15, %v1950_v16  ;;  %v2477_v49 = vld [vmem:[#allocation2 + $0x13c] sm:$0xf] }
  0x36   :  { %1431 = vmatpush.bf16.msrb.mxu2 %v2297_v24  ;;  %v306_v24 = vunpack.c.l.b16 %v32_v9  ;;  %v1830_v51 = vld [vmem:[#allocation2 + $0x144] sm:$0xf0]  ;;  %v2525_v54 = vld [vmem:[#allocation2 + $0x2bc] sm:$0xf]  ;;  %v1722_v60 = vld [vmem:[#allocation2 + $0x6c] sm:$0xf0] }
  0x37   :  { %1444 = vmatpush.bf16.msrb.mxu3 %v2393_v28  ;;  %v307_v28 = vunpack.c.h.b16 %v32_v9  ;;  %v1926_v53 = vld [vmem:[#allocation2 + $0x204] sm:$0xf0]  ;;  %v1833_v57 = vor.u32 %v2477_v49, %v1830_v51  ;;  %v2474_v61 = vld [vmem:[#allocation2 + $0x124] sm:$0xf]  ;;  %v1914_v1 = vld [vmem:[#allocation2 + $0x1ec] sm:$0xf0] }
  0x38   :  { %1406 = vmatpush.bf16.msrb.mxu0 %v2093_v34  ;;  %v2049_v34 = vor.u32 %v2531_v22, %v2046_v23  ;;  %v2711_v41 = vpack.c.b16 %v306_v24, %v306_v24  ;;  %v2022_v55 = vld [vmem:[#allocation2 + $0x2c4] sm:$0xf0]  ;;  %v2522_v2 = vld [vmem:[#allocation2 + $0x2a4] sm:$0xf]  ;;  %v2010_v3 = vld [vmem:[#allocation2 + $0x2ac] sm:$0xf0] }
  0x39   :  { %1419 = vmatpush.bf16.msrb.mxu1 %v2189_v35  ;;  %v1842_v35 = vld [vmem:[#allocation2 + $0x15c] sm:$0xf0]  ;;  %v2715_v44 = vpack.c.b16 %v307_v28, %v307_v28  ;;  %v2025_v62 = vor.u32 %v2525_v54, %v2022_v55  ;;  %v2447_v9 = vld [vmem:[#allocation2 + $0x4c] sm:$0xf]  ;;  %v1710_v10 = vld [vmem:[#allocation2 + $0x54] sm:$0xf0]  ;;  %v2013_v12 = vor.u32 %v2522_v2, %v2010_v3 }
  0x3a   :  { %1432 = vmatpush.bf16.msrb.mxu2 %v2285_v36  ;;  %v2504_v36 = vld [vmem:[#allocation2 + $0x214] sm:$0xf]  ;;  %v1845_v45 = vor.u32 %v2480_v33, %v1842_v35  ;;  %v2471_v11 = vld [vmem:[#allocation2 + $0x10c] sm:$0xf]  ;;  %v1902_v15 = vld [vmem:[#allocation2 + $0x1d4] sm:$0xf0] }
  0x3b   :  { %1445 = vmatpush.bf16.msrb.mxu3 %v2381_v40  ;;  %v2034_v40 = vld [vmem:[#allocation2 + $0x2dc] sm:$0xf0]  ;;  %v2495_v14 = vld [vmem:[#allocation2 + $0x1cc] sm:$0xf]  ;;  %v1998_v17 = vld [vmem:[#allocation2 + $0x294] sm:$0xf0] }
  0x3c   :  { %1407 = vmatpush.bf16.msrb.mxu0 %v2081_v46  ;;  %v1941_v46 = vor.u32 %v2504_v36, %v1938_v37  ;;  %v2037_v50 = vor.u32 %v2528_v39, %v2034_v40  ;;  %v2519_v16 = vld [vmem:[#allocation2 + $0x28c] sm:$0xf]  ;;  %v1905_v22 = vor.u32 %v2495_v14, %v1902_v15  ;;  %v2444_v23 = vld [vmem:[#allocation2 + $0x34] sm:$0xf]  ;;  %v1698_v24 = vld [vmem:[#allocation2 + $0x3c] sm:$0xf0] }
  0x3d   :  { %1420 = vmatpush.bf16.msrb.mxu1 %v2177_v47  ;;  %v2453_v47 = vld [vmem:[#allocation2 + $0x7c] sm:$0xf]  ;;  %v2468_v25 = vld [vmem:[#allocation2 + $0xf4] sm:$0xf]  ;;  %v1986_v31 = vld [vmem:[#allocation2 + $0x27c] sm:$0xf0]  ;;  %v1701_v32 = vor.u32 %v2444_v23, %v1698_v24 }
  0x3e   :  { %1433 = vmatpush.bf16.msrb.mxu2 %v2273_v48  ;;  %v1734_v48 = vld [vmem:[#allocation2 + $0x84] sm:$0xf0]  ;;  %v2492_v28 = vld [vmem:[#allocation2 + $0x1b4] sm:$0xf]  ;;  %v2441_v35 = vld [vmem:[#allocation2 + $0x1c] sm:$0xf] }
  0x3f   :  { %1446 = vmatpush.bf16.msrb.mxu3 %v2369_v52  ;;  %v2501_v52 = vld [vmem:[#allocation2 + $0x1fc] sm:$0xf]  ;;  %v1737_v56 = vor.u32 %v2453_v47, %v1734_v48  ;;  %v1686_v36 = vld [vmem:[#allocation2 + $0x24] sm:$0xf0]  ;;  %v2438_v49 = vld [vmem:[#allocation2 + $0x4] sm:$0xf] }
  0x40   :  { %1408 = vmatpush.bf16.msrb.mxu0 %v2069_v59  ;;  %v1929_v58 = vor.u32 %v2501_v52, %v1926_v53  ;;  %v2450_v59 = vld [vmem:[#allocation2 + $0x64] sm:$0xf]  ;;  %v2465_v37 = vld [vmem:[#allocation2 + $0xdc] sm:$0xf]  ;;  %v1782_v40 = vld [vmem:[#allocation2 + $0xe4] sm:$0xf0]  ;;  %v1689_v48 = vor.u32 %v2441_v35, %v1686_v36 }
  0x41   :  { %1421 = vmatpush.bf16.msrb.mxu1 %v2165_v63  ;;  %v1818_v63 = vld [vmem:[#allocation2 + $0x12c] sm:$0xf0]  ;;  %v1974_v47 = vld [vmem:[#allocation2 + $0x264] sm:$0xf0]  ;;  %v1785_v51 = vor.u32 %v2465_v37, %v1782_v40  ;;  %v2462_v53 = vld [vmem:[#allocation2 + $0xc4] sm:$0xf] }
  0x42   :  { %1434 = vmatpush.bf16.msrb.mxu2 %v2261_v0  ;;  %v2498_v0 = vld [vmem:[#allocation2 + $0x1e4] sm:$0xf]  ;;  %v1821_v7 = vor.u32 %v2474_v61, %v1818_v63  ;;  %v1770_v54 = vld [vmem:[#allocation2 + $0xcc] sm:$0xf0]  ;;  %v2142_v61 = vld [vmem:[#allocation2 + $0x3b4] sm:$0xf0] }
  0x43   :  { %1447 = vmatpush.bf16.msrb.mxu3 %v2357_v5  ;;  %v1725_v5 = vor.u32 %v2450_v59, %v1722_v60  ;;  %v1917_v8 = vor.u32 %v2498_v0, %v1914_v1  ;;  %v2486_v55 = vld [vmem:[#allocation2 + $0x184] sm:$0xf]  ;;  %v1962_v59 = vld [vmem:[#allocation2 + $0x24c] sm:$0xf0]  ;;  %v2555_v60 = vld [vmem:[#allocation2 + $0x3ac] sm:$0xf]  ;;  %v1773_v3 = vor.u32 %v2462_v53, %v1770_v54 }
  0x44   :  { %1409 = vmatpush.bf16.msrb.mxu0 %v2057_v13  ;;  %v1806_v13 = vld [vmem:[#allocation2 + $0x114] sm:$0xf0]  ;;  %v2603_v1 = vld [vmem:[#allocation2 + $0x52c] sm:$0xf]  ;;  %v2130_v14 = vld [vmem:[#allocation2 + $0x39c] sm:$0xf0] }
  0x45   :  { %1422 = vmatpush.bf16.msrb.mxu1 %v2153_v18  ;;  %v1713_v18 = vor.u32 %v2447_v9, %v1710_v10  ;;  %v2238_v0 = vld [vmem:[#allocation2 + $0x474] sm:$0xf0]  ;;  %v2145_v10 = vor.u32 %v2555_v60, %v2142_v61  ;;  %v2576_v15 = vld [vmem:[#allocation2 + $0x454] sm:$0xf]  ;;  %v2418_v23 = vld [vmem:[#allocation2 + $0x5dc] sm:$0xf0] }
  0x46   :  { %1435 = vmatpush.bf16.msrb.mxu2 %v2249_v19  ;;  %v1809_v19 = vor.u32 %v2471_v11, %v1806_v13  ;;  %v2334_v2 = vld [vmem:[#allocation2 + $0x534] sm:$0xf0]  ;;  %v2552_v13 = vld [vmem:[#allocation2 + $0x394] sm:$0xf]  ;;  %v2406_v35 = vld [vmem:[#allocation2 + $0x5c4] sm:$0xf0] }
  0x47   :  { %1448 = vmatpush.bf16.msrb.mxu3 %v2345_v26  ;;  %1410 = vmatmul.bf16.vlgmr.msrb.gmra.mxu0 %v2711_v41  ;;  %v2001_v26 = vor.u32 %v2519_v16, %v1998_v17  ;;  %v2226_v17 = vld [vmem:[#allocation2 + $0x45c] sm:$0xf0]  ;;  %v2133_v24 = vor.u32 %v2552_v13, %v2130_v14  ;;  %v2546_v40 = vld [vmem:[#allocation2 + $0x364] sm:$0xf]  ;;  %v2591_v60 = vld [vmem:[#allocation2 + $0x4cc] sm:$0xf] }
  0x48   :  { %1454 = vmatpush.bf16.msra.mxu0 %v1761_v27  ;;  %1423 = vmatmul.bf16.vlgmr.msrb.gmra.mxu1 %v2715_v44  ;;  %v1794_v27 = vld [vmem:[#allocation2 + $0xfc] sm:$0xf0]  ;;  %v2286_v61 = vld [vmem:[#allocation2 + $0x4d4] sm:$0xf0] }
  0x49   :  { %1467 = vmatpush.bf16.msra.mxu1 %v1857_v29  ;;  %1436 = vmatmul.bf16.vlgmr.msrb.gmra.mxu2 %v2709_v38  ;;  %v1890_v29 = vld [vmem:[#allocation2 + $0x1bc] sm:$0xf0]  ;;  %v1797_v33 = vor.u32 %v2468_v25, %v1794_v27  ;;  %v2229_v25 = vor.u32 %v2576_v15, %v2226_v17  ;;  %v2549_v27 = vld [vmem:[#allocation2 + $0x37c] sm:$0xf] }
  0x4a   :  { %1480 = vmatpush.bf16.msra.mxu2 %v1953_v30  ;;  %1449 = vmatmul.bf16.vlgmr.msrb.gmra.mxu3 %v2713_v42  ;;  %v2516_v30 = vld [vmem:[#allocation2 + $0x274] sm:$0xf]  ;;  %v2370_v13 = vld [vmem:[#allocation2 + $0x57c] sm:$0xf0]  ;;  %v2537_v17 = vld [vmem:[#allocation2 + $0x31c] sm:$0xf] }
  0x4b   :  { %1493 = vmatpush.bf16.msra.mxu3 %v2049_v34  ;;  %v1893_v34 = vor.u32 %v2492_v28, %v1890_v29  ;;  %v1989_v39 = vor.u32 %v2516_v30, %v1986_v31  ;;  %v2118_v28 = vld [vmem:[#allocation2 + $0x384] sm:$0xf0]  ;;  %v2573_v29 = vld [vmem:[#allocation2 + $0x43c] sm:$0xf] }
  0x4c   :  { %1455 = vmatpush.bf16.msra.mxu0 %v1749_v43  ;;  %v2489_v43 = vld [vmem:[#allocation2 + $0x19c] sm:$0xf]  ;;  %v2214_v31 = vld [vmem:[#allocation2 + $0x444] sm:$0xf0]  ;;  %v2121_v36 = vor.u32 %v2549_v27, %v2118_v28 }
  0x4d   :  { %1468 = vmatpush.bf16.msra.mxu1 %v1845_v45  ;;  %v1878_v45 = vld [vmem:[#allocation2 + $0x1a4] sm:$0xf0]  ;;  %v2217_v37 = vor.u32 %v2573_v29, %v2214_v31  ;;  %v2534_v29 = vld [vmem:[#allocation2 + $0x304] sm:$0xf] }
  0x4e   :  { %1481 = vmatpush.bf16.msra.mxu2 %v1941_v46  ;;  %v2513_v46 = vld [vmem:[#allocation2 + $0x25c] sm:$0xf]  ;;  %v1881_v52 = vor.u32 %v2489_v43, %v1878_v45  ;;  %v2106_v43 = vld [vmem:[#allocation2 + $0x36c] sm:$0xf0]  ;;  %v2570_v45 = vld [vmem:[#allocation2 + $0x424] sm:$0xf] }
  0x4f   :  { %1494 = vmatpush.bf16.msra.mxu3 %v2037_v50  ;;  %v1674_v50 = vld [vmem:[#allocation2 + $0xc] sm:$0xf0]  ;;  %v2358_v27 = vld [vmem:[#allocation2 + $0x564] sm:$0xf0] }
  0x50   :  { %1456 = vmatpush.bf16.msra.mxu0 %v1737_v56  ;;  %v1977_v56 = vor.u32 %v2513_v46, %v1974_v47  ;;  %v1677_v63 = vor.u32 %v2438_v49, %v1674_v50  ;;  %v2202_v47 = vld [vmem:[#allocation2 + $0x42c] sm:$0xf0]  ;;  %v2618_v50 = vld [vmem:[#allocation2 + $0x5a4] sm:$0xf] }
  0x51   :  { %1469 = vmatpush.bf16.msra.mxu1 %v1833_v57  ;;  %v1866_v57 = vld [vmem:[#allocation2 + $0x18c] sm:$0xf0]  ;;  %v2205_v53 = vor.u32 %v2570_v45, %v2202_v47  ;;  %v2461_v45 = vld [vmem:[#allocation2 + $0xb8] sm:$0xf0] }
  0x52   :  { %1482 = vmatpush.bf16.msra.mxu2 %v1929_v58  ;;  %v2510_v58 = vld [vmem:[#allocation2 + $0x244] sm:$0xf]  ;;  %v2298_v49 = vld [vmem:[#allocation2 + $0x4ec] sm:$0xf0] }
  0x53   :  { %1495 = vmatpush.bf16.msra.mxu3 %v2025_v62  ;;  %v2579_v62 = vld [vmem:[#allocation2 + $0x46c] sm:$0xf]  ;;  %v1965_v9 = vor.u32 %v2510_v58, %v1962_v59  ;;  %v2190_v59 = vld [vmem:[#allocation2 + $0x414] sm:$0xf0] }
  0x54   :  { %1457 = vmatpush.bf16.msra.mxu0 %v1725_v5  ;;  %v1869_v5 = vor.u32 %v2486_v55, %v1866_v57  ;;  %v2241_v11 = vor.u32 %v2579_v62, %v2238_v0  ;;  %v2543_v55 = vld [vmem:[#allocation2 + $0x34c] sm:$0xf] }
  0x55   :  { %1470 = vmatpush.bf16.msra.mxu1 %v1821_v7  ;;  %v2627_v7 = vld [vmem:[#allocation2 + $0x5ec] sm:$0xf] }
  0x56   :  { %1483 = vmatpush.bf16.msra.mxu2 %v1917_v8  ;;  %v2430_v8 = vld [vmem:[#allocation2 + $0x5f4] sm:$0xf0]  ;;  %v2567_v57 = vld [vmem:[#allocation2 + $0x40c] sm:$0xf] }
  0x57   :  { %1496 = vmatpush.bf16.msra.mxu3 %v2013_v12  ;;  %v2337_v12 = vor.u32 %v2603_v1, %v2334_v2  ;;  %v2433_v16 = vor.u32 %v2627_v7, %v2430_v8  ;;  %v2615_v62 = vld [vmem:[#allocation2 + $0x58c] sm:$0xf]  ;;  %v2193_v1 = vor.u32 %v2567_v57, %v2190_v59  ;;  %v2289_v2 = vor.u32 %v2591_v60, %v2286_v61  ;;  %v2564_v7 = vld [vmem:[#allocation2 + $0x3f4] sm:$0xf]  ;;  %v1752_v59 = vld [vmem:[#allocation2 + $0x98] sm:$0xf] }
  0x58   :  { %1458 = vmatpush.bf16.msra.mxu0 %v1713_v18  ;;  %v2600_v18 = vld [vmem:[#allocation2 + $0x514] sm:$0xf]  ;;  %v2458_v60 = vld [vmem:[#allocation2 + $0xa0] sm:$0xf0]  ;;  %v1848_v61 = vld [vmem:[#allocation2 + $0x158] sm:$0xf] }
  0x59   :  { %1471 = vmatpush.bf16.msra.mxu1 %v1809_v19  ;;  %v2322_v19 = vld [vmem:[#allocation2 + $0x51c] sm:$0xf0] }
  0x5a   :  { %1484 = vmatpush.bf16.msra.mxu2 %v1905_v22  ;;  %v2624_v22 = vld [vmem:[#allocation2 + $0x5d4] sm:$0xf] }
  0x5b   :  { %1497 = vmatpush.bf16.msra.mxu3 %v2001_v26  ;;  %v2325_v26 = vor.u32 %v2600_v18, %v2322_v19  ;;  %v2421_v30 = vor.u32 %v2624_v22, %v2418_v23  ;;  %v2070_v18 = vld [vmem:[#allocation2 + $0x324] sm:$0xf0]  ;;  %v2561_v19 = vld [vmem:[#allocation2 + $0x3dc] sm:$0xf] }
  0x5c   :  { %1459 = vmatpush.bf16.msra.mxu0 %v1701_v32  ;;  %v2597_v32 = vld [vmem:[#allocation2 + $0x4fc] sm:$0xf]  ;;  %v2166_v23 = vld [vmem:[#allocation2 + $0x3e4] sm:$0xf0]  ;;  %v2073_v28 = vor.u32 %v2537_v17, %v2070_v18  ;;  %v2527_v17 = vld [vmem:[#allocation2 + $0x2c8] sm:$0xf0] }
  0x5d   :  { %1472 = vmatpush.bf16.msra.mxu1 %v1797_v33  ;;  %v2310_v33 = vld [vmem:[#allocation2 + $0x504] sm:$0xf0]  ;;  %v2169_v31 = vor.u32 %v2561_v19, %v2166_v23 }
  0x5e   :  { %1485 = vmatpush.bf16.msra.mxu2 %v1893_v34  ;;  %v2621_v34 = vld [vmem:[#allocation2 + $0x5bc] sm:$0xf]  ;;  %v1728_v23 = vld [vmem:[#allocation2 + $0x68] sm:$0xf] }
  0x5f   :  { %1498 = vmatpush.bf16.msra.mxu3 %v1989_v39  ;;  %v2313_v39 = vor.u32 %v2597_v32, %v2310_v33  ;;  %v2409_v46 = vor.u32 %v2621_v34, %v2406_v35  ;;  %v2558_v33 = vld [vmem:[#allocation2 + $0x3c4] sm:$0xf]  ;;  %v2154_v34 = vld [vmem:[#allocation2 + $0x3cc] sm:$0xf0] }
  0x60   :  { %1460 = vmatpush.bf16.msra.mxu0 %v1689_v48  ;;  %v2594_v48 = vld [vmem:[#allocation2 + $0x4e4] sm:$0xf] }
  0x61   :  { %1473 = vmatpush.bf16.msra.mxu1 %v1785_v51  ;;  %v2394_v51 = vld [vmem:[#allocation2 + $0x5ac] sm:$0xf0]  ;;  %v2301_v54 = vor.u32 %v2594_v48, %v2298_v49  ;;  %v2582_v35 = vld [vmem:[#allocation2 + $0x484] sm:$0xf]  ;;  %v2485_v48 = vld [vmem:[#allocation2 + $0x178] sm:$0xf0] }
  0x62   :  { %1486 = vmatpush.bf16.msra.mxu2 %v1881_v52  ;;  %v2109_v52 = vor.u32 %v2546_v40, %v2106_v43  ;;  %v2397_v58 = vor.u32 %v2618_v50, %v2394_v51  ;;  %v2346_v40 = vld [vmem:[#allocation2 + $0x54c] sm:$0xf0]  ;;  %v2509_v50 = vld [vmem:[#allocation2 + $0x238] sm:$0xf0]  ;;  %v2157_v51 = vor.u32 %v2558_v33, %v2154_v34 }
  0x63   :  { %1499 = vmatpush.bf16.msra.mxu3 %v1977_v56  ;;  %v2094_v56 = vld [vmem:[#allocation2 + $0x354] sm:$0xf0]  ;;  %v1764_v43 = vld [vmem:[#allocation2 + $0xb0] sm:$0xf] }
  0x64   :  { %1461 = vmatpush.bf16.msra.mxu0 %v1677_v63  ;;  %v2382_v63 = vld [vmem:[#allocation2 + $0x594] sm:$0xf0]  ;;  %v2097_v0 = vor.u32 %v2543_v55, %v2094_v56  ;;  %v1956_v49 = vld [vmem:[#allocation2 + $0x230] sm:$0xf]  ;;  %v1765_v56 = vor.u32 %v2461_v45, %v1764_v43  ;;  %v2497_v45 = vld [vmem:[#allocation2 + $0x1d8] sm:$0xf0] }
  0x65   :  { %1474 = vmatpush.bf16.msra.mxu1 %v1773_v3  ;;  %v2540_v3 = vld [vmem:[#allocation2 + $0x334] sm:$0xf]  ;;  %v2385_v8 = vor.u32 %v2615_v62, %v2382_v63  ;;  %v2482_v63 = vld [vmem:[#allocation2 + $0x160] sm:$0xf0]  ;;  %v1908_v43 = vld [vmem:[#allocation2 + $0x1d0] sm:$0xf] }
  0x66   :  { %1487 = vmatpush.bf16.msra.mxu2 %v1869_v5  ;;  %v2082_v5 = vld [vmem:[#allocation2 + $0x33c] sm:$0xf0] }
  0x67   :  { %1500 = vmatpush.bf16.msra.mxu3 %v1965_v9  ;;  %1462 = vmatmul.bf16.vlgmr.msra.gmra.mxu0 %v2696_v20  ;;  %v2178_v9 = vld [vmem:[#allocation2 + $0x3fc] sm:$0xf0]  ;;  %v2085_v14 = vor.u32 %v2540_v3, %v2082_v5  ;;  %v2530_v3 = vld [vmem:[#allocation2 + $0x2e0] sm:$0xf0]  ;;  %v1753_v5 = vor.u32 %v2458_v60, %v1752_v59 }
  0x68   :  { %1506 = vmatpush.bf16.msrb.mxu0 %v2145_v10  ;;  %1475 = vmatmul.bf16.vlgmr.msra.gmra.mxu1 %v2699_v21  ;;  %v2588_v10 = vld [vmem:[#allocation2 + $0x4b4] sm:$0xf]  ;;  %v2181_v15 = vor.u32 %v2564_v7, %v2178_v9  ;;  %v1849_v7 = vor.u32 %v2482_v63, %v1848_v61  ;;  %v1740_v9 = vld [vmem:[#allocation2 + $0x80] sm:$0xf]  ;;  %v2518_v59 = vld [vmem:[#allocation2 + $0x280] sm:$0xf0] }
  0x69   :  { %1519 = vmatpush.bf16.msrb.mxu1 %v2241_v11  ;;  %1488 = vmatmul.bf16.vlgmr.msra.gmra.mxu2 %v2688_v4  ;;  %v2274_v11 = vld [vmem:[#allocation2 + $0x4bc] sm:$0xf0] }
  0x6a   :  { %1532 = vmatpush.bf16.msrb.mxu2 %v2337_v12  ;;  %1501 = vmatmul.bf16.vlgmr.msra.gmra.mxu3 %v2693_v6  ;;  %v2612_v12 = vld [vmem:[#allocation2 + $0x574] sm:$0xf]  ;;  %v1692_v63 = vld [vmem:[#allocation2 + $0x20] sm:$0xf] }
  0x6b   :  { %1545 = vmatpush.bf16.msrb.mxu3 %v2433_v16  ;;  %v2277_v16 = vor.u32 %v2588_v10, %v2274_v11  ;;  %v2373_v22 = vor.u32 %v2612_v12, %v2370_v13  ;;  %v2455_v10 = vld [vmem:[#allocation2 + $0x88] sm:$0xf0]  ;;  %v1836_v11 = vld [vmem:[#allocation2 + $0x140] sm:$0xf] }
  0x6c   :  { %1507 = vmatpush.bf16.msrb.mxu0 %v2133_v24  ;;  %v2585_v24 = vld [vmem:[#allocation2 + $0x49c] sm:$0xf]  ;;  %v2479_v13 = vld [vmem:[#allocation2 + $0x148] sm:$0xf0]  ;;  %v1741_v18 = vor.u32 %v2455_v10, %v1740_v9 }
  0x6d   :  { %1520 = vmatpush.bf16.msrb.mxu1 %v2229_v25  ;;  %v2262_v25 = vld [vmem:[#allocation2 + $0x4a4] sm:$0xf0]  ;;  %v1837_v19 = vor.u32 %v2479_v13, %v1836_v11  ;;  %v2515_v9 = vld [vmem:[#allocation2 + $0x268] sm:$0xf0] }
  0x6e   :  { %1533 = vmatpush.bf16.msrb.mxu2 %v2325_v26  ;;  %v2609_v26 = vld [vmem:[#allocation2 + $0x55c] sm:$0xf]  ;;  %v2265_v32 = vor.u32 %v2585_v24, %v2262_v25  ;;  %v2452_v24 = vld [vmem:[#allocation2 + $0x70] sm:$0xf0]  ;;  %v1824_v25 = vld [vmem:[#allocation2 + $0x128] sm:$0xf] }
  0x6f   :  { %1546 = vmatpush.bf16.msrb.mxu3 %v2421_v30  ;;  %v2058_v30 = vld [vmem:[#allocation2 + $0x30c] sm:$0xf0]  ;;  %v1680_v11 = vld [vmem:[#allocation2 + $0x8] sm:$0xf] }
  0x70   :  { %1508 = vmatpush.bf16.msrb.mxu0 %v2121_v36  ;;  %v2361_v36 = vor.u32 %v2609_v26, %v2358_v27  ;;  %v2061_v47 = vor.u32 %v2534_v29, %v2058_v30  ;;  %v2476_v27 = vld [vmem:[#allocation2 + $0x130] sm:$0xf0]  ;;  %v2016_v30 = vld [vmem:[#allocation2 + $0x2a8] sm:$0xf] }
  0x71   :  { %1521 = vmatpush.bf16.msrb.mxu1 %v2217_v37  ;;  %v2250_v37 = vld [vmem:[#allocation2 + $0x48c] sm:$0xf0]  ;;  %v2500_v29 = vld [vmem:[#allocation2 + $0x1f0] sm:$0xf0]  ;;  %v1825_v33 = vor.u32 %v2476_v27, %v1824_v25  ;;  %v2557_v25 = vld [vmem:[#allocation2 + $0x3b8] sm:$0xf0] }
  0x72   :  { %1534 = vmatpush.bf16.msrb.mxu2 %v2313_v39  ;;  %v2606_v39 = vld [vmem:[#allocation2 + $0x544] sm:$0xf] }
  0x73   :  { %1547 = vmatpush.bf16.msrb.mxu3 %v2409_v46  ;;  %v1860_v46 = vld [vmem:[#allocation2 + $0x170] sm:$0xf]  ;;  %v2349_v55 = vor.u32 %v2606_v39, %v2346_v40  ;;  %v2473_v40 = vld [vmem:[#allocation2 + $0x118] sm:$0xf0] }
  0x74   :  { %1509 = vmatpush.bf16.msrb.mxu0 %v2109_v52  ;;  %v2253_v52 = vor.u32 %v2582_v35, %v2250_v37  ;;  %v1861_v57 = vor.u32 %v2485_v48, %v1860_v46  ;;  %v1716_v35 = vld [vmem:[#allocation2 + $0x50] sm:$0xf] }
  0x75   :  { %1522 = vmatpush.bf16.msrb.mxu1 %v2205_v53  ;;  %v2052_v53 = vld [vmem:[#allocation2 + $0x2f0] sm:$0xf] }
  0x76   :  { %1535 = vmatpush.bf16.msrb.mxu2 %v2301_v54  ;;  %v2533_v54 = vld [vmem:[#allocation2 + $0x2f8] sm:$0xf0]  ;;  %v1812_v37 = vld [vmem:[#allocation2 + $0x110] sm:$0xf] }
  0x77   :  { %1548 = vmatpush.bf16.msrb.mxu3 %v2397_v58  ;;  %v1957_v58 = vor.u32 %v2509_v50, %v1956_v49  ;;  %v2053_v62 = vor.u32 %v2533_v54, %v2052_v53  ;;  %v2004_v46 = vld [vmem:[#allocation2 + $0x290] sm:$0xf]  ;;  %v1813_v49 = vor.u32 %v2473_v40, %v1812_v37  ;;  %v1909_v50 = vor.u32 %v2497_v45, %v1908_v43  ;;  %v1800_v53 = vld [vmem:[#allocation2 + $0xf8] sm:$0xf]  ;;  %v2554_v43 = vld [vmem:[#allocation2 + $0x3a0] sm:$0xf0] }
  0x78   :  { %1510 = vmatpush.bf16.msrb.mxu0 %v2097_v0  ;;  %v1944_v0 = vld [vmem:[#allocation2 + $0x218] sm:$0xf] }
  0x79   :  { %1523 = vmatpush.bf16.msrb.mxu1 %v2193_v1  ;;  %v2506_v1 = vld [vmem:[#allocation2 + $0x220] sm:$0xf0]  ;;  %v2136_v40 = vld [vmem:[#allocation2 + $0x398] sm:$0xf] }
  0x7a   :  { %1536 = vmatpush.bf16.msrb.mxu2 %v2289_v2  ;;  %v2040_v2 = vld [vmem:[#allocation2 + $0x2d8] sm:$0xf] }
  0x7b   :  { %1549 = vmatpush.bf16.msrb.mxu3 %v2385_v8  ;;  %v1945_v8 = vor.u32 %v2506_v1, %v1944_v0  ;;  %v2041_v12 = vor.u32 %v2530_v3, %v2040_v2  ;;  %v2443_v0 = vld [vmem:[#allocation2 + $0x28] sm:$0xf0]  ;;  %v1788_v1 = vld [vmem:[#allocation2 + $0xe0] sm:$0xf]  ;;  %v2232_v45 = vld [vmem:[#allocation2 + $0x458] sm:$0xf] }
  0x7c   :  { %1511 = vmatpush.bf16.msrb.mxu0 %v2085_v14  ;;  %v1932_v14 = vld [vmem:[#allocation2 + $0x200] sm:$0xf]  ;;  %v2467_v3 = vld [vmem:[#allocation2 + $0xe8] sm:$0xf0]  ;;  %v1693_v10 = vor.u32 %v2443_v0, %v1692_v63 }
  0x7d   :  { %1524 = vmatpush.bf16.msrb.mxu1 %v2181_v15  ;;  %v2503_v15 = vld [vmem:[#allocation2 + $0x208] sm:$0xf0]  ;;  %v1789_v13 = vor.u32 %v2467_v3, %v1788_v1  ;;  %v2112_v3 = vld [vmem:[#allocation2 + $0x368] sm:$0xf] }
  0x7e   :  { %1537 = vmatpush.bf16.msrb.mxu2 %v2277_v16  ;;  %v2028_v16 = vld [vmem:[#allocation2 + $0x2c0] sm:$0xf]  ;;  %v2623_v63 = vld [vmem:[#allocation2 + $0x5c8] sm:$0xf0] }
  0x7f   :  { %1550 = vmatpush.bf16.msrb.mxu3 %v2373_v22  ;;  %v1933_v22 = vor.u32 %v2503_v15, %v1932_v14  ;;  %v2029_v26 = vor.u32 %v2527_v17, %v2028_v16  ;;  %v1776_v15 = vld [vmem:[#allocation2 + $0xc8] sm:$0xf]  ;;  %v2464_v16 = vld [vmem:[#allocation2 + $0xd0] sm:$0xf0] }
  0x80   :  { %1512 = vmatpush.bf16.msrb.mxu0 %v2073_v28  ;;  %v1920_v28 = vld [vmem:[#allocation2 + $0x1e8] sm:$0xf] }
  0x81   :  { %1525 = vmatpush.bf16.msrb.mxu1 %v2169_v31  ;;  %v2524_v31 = vld [vmem:[#allocation2 + $0x2b0] sm:$0xf0]  ;;  %v1921_v34 = vor.u32 %v2500_v29, %v1920_v28  ;;  %v1872_v17 = vld [vmem:[#allocation2 + $0x188] sm:$0xf]  ;;  %v2581_v28 = vld [vmem:[#allocation2 + $0x478] sm:$0xf0] }
  0x82   :  { %1538 = vmatpush.bf16.msrb.mxu2 %v2265_v32  ;;  %v1729_v32 = vor.u32 %v2452_v24, %v1728_v23  ;;  %v2017_v39 = vor.u32 %v2524_v31, %v2016_v30  ;;  %v2512_v23 = vld [vmem:[#allocation2 + $0x250] sm:$0xf0]  ;;  %v2148_v24 = vld [vmem:[#allocation2 + $0x3b0] sm:$0xf]  ;;  %v2605_v30 = vld [vmem:[#allocation2 + $0x538] sm:$0xf0]  ;;  %v1777_v31 = vor.u32 %v2464_v16, %v1776_v15 }
  0x83   :  { %1551 = vmatpush.bf16.msrb.mxu3 %v2361_v36  ;;  %v2449_v36 = vld [vmem:[#allocation2 + $0x58] sm:$0xf0]  ;;  %v2340_v29 = vld [vmem:[#allocation2 + $0x530] sm:$0xf] }
  0x84   :  { %1513 = vmatpush.bf16.msrb.mxu0 %v2061_v47  ;;  %v2521_v47 = vld [vmem:[#allocation2 + $0x298] sm:$0xf0]  ;;  %v1717_v48 = vor.u32 %v2449_v36, %v1716_v35  ;;  %v2149_v36 = vor.u32 %v2557_v25, %v2148_v24  ;;  %v2196_v15 = vld [vmem:[#allocation2 + $0x410] sm:$0xf] }
  0x85   :  { %1526 = vmatpush.bf16.msrb.mxu1 %v2157_v51  ;;  %v1704_v51 = vld [vmem:[#allocation2 + $0x38] sm:$0xf]  ;;  %v2005_v54 = vor.u32 %v2521_v47, %v2004_v46  ;;  %v2578_v47 = vld [vmem:[#allocation2 + $0x460] sm:$0xf0] }
  0x86   :  { %1539 = vmatpush.bf16.msrb.mxu2 %v2253_v52  ;;  %v2446_v52 = vld [vmem:[#allocation2 + $0x40] sm:$0xf0] }
  0x87   :  { %1552 = vmatpush.bf16.msrb.mxu3 %v2349_v55  ;;  %1514 = vmatmul.bf16.vlgmr.msrb.gmra.mxu0 %v2711_v41  ;;  %v2470_v55 = vld [vmem:[#allocation2 + $0x100] sm:$0xf0]  ;;  %v1705_v60 = vor.u32 %v2446_v52, %v1704_v51  ;;  %v2137_v52 = vor.u32 %v2554_v43, %v2136_v40 }
  0x88   :  { %1558 = vmatpush.bf16.msra.mxu0 %v1765_v56  ;;  %1527 = vmatmul.bf16.vlgmr.msrb.gmra.mxu1 %v2715_v44  ;;  %v1896_v56 = vld [vmem:[#allocation2 + $0x1b8] sm:$0xf]  ;;  %v1801_v61 = vor.u32 %v2470_v55, %v1800_v53  ;;  %v2626_v51 = vld [vmem:[#allocation2 + $0x5e0] sm:$0xf0]  ;;  %v2233_v53 = vor.u32 %v2578_v47, %v2232_v45  ;;  %v2124_v55 = vld [vmem:[#allocation2 + $0x380] sm:$0xf] }
  0x89   :  { %1571 = vmatpush.bf16.msra.mxu1 %v1861_v57  ;;  %1540 = vmatmul.bf16.vlgmr.msrb.gmra.mxu2 %v2709_v38  ;;  %v2494_v57 = vld [vmem:[#allocation2 + $0x1c0] sm:$0xf0]  ;;  %v2539_v47 = vld [vmem:[#allocation2 + $0x328] sm:$0xf0] }
  0x8a   :  { %1584 = vmatpush.bf16.msra.mxu2 %v1957_v58  ;;  %1553 = vmatmul.bf16.vlgmr.msrb.gmra.mxu3 %v2713_v42  ;;  %v1992_v58 = vld [vmem:[#allocation2 + $0x278] sm:$0xf] }
  0x8b   :  { %1597 = vmatpush.bf16.msra.mxu3 %v2053_v62  ;;  %v1897_v62 = vor.u32 %v2494_v57, %v1896_v56  ;;  %v1993_v2 = vor.u32 %v2518_v59, %v1992_v58  ;;  %v2551_v56 = vld [vmem:[#allocation2 + $0x388] sm:$0xf0]  ;;  %v2220_v57 = vld [vmem:[#allocation2 + $0x440] sm:$0xf] }
  0x8c   :  { %1559 = vmatpush.bf16.msra.mxu0 %v1753_v5  ;;  %v1884_v5 = vld [vmem:[#allocation2 + $0x1a0] sm:$0xf]  ;;  %v2575_v59 = vld [vmem:[#allocation2 + $0x448] sm:$0xf0]  ;;  %v2125_v0 = vor.u32 %v2551_v56, %v2124_v55 }
  0x8d   :  { %1572 = vmatpush.bf16.msra.mxu1 %v1849_v7  ;;  %v2491_v7 = vld [vmem:[#allocation2 + $0x1a8] sm:$0xf0]  ;;  %v2221_v1 = vor.u32 %v2575_v59, %v2220_v57  ;;  %v2364_v55 = vld [vmem:[#allocation2 + $0x560] sm:$0xf] }
  0x8e   :  { %1585 = vmatpush.bf16.msra.mxu2 %v1945_v8  ;;  %v1980_v8 = vld [vmem:[#allocation2 + $0x260] sm:$0xf]  ;;  %v1885_v14 = vor.u32 %v2491_v7, %v1884_v5  ;;  %v2548_v5 = vld [vmem:[#allocation2 + $0x370] sm:$0xf0]  ;;  %v2611_v56 = vld [vmem:[#allocation2 + $0x568] sm:$0xf0] }
  0x8f   :  { %1598 = vmatpush.bf16.msra.mxu3 %v2041_v12  ;;  %v2440_v12 = vld [vmem:[#allocation2 + $0x10] sm:$0xf0] }
  0x90   :  { %1560 = vmatpush.bf16.msra.mxu0 %v1741_v18  ;;  %v1981_v18 = vor.u32 %v2515_v9, %v1980_v8  ;;  %v1681_v27 = vor.u32 %v2440_v12, %v1680_v11  ;;  %v2572_v8 = vld [vmem:[#allocation2 + $0x430] sm:$0xf0]  ;;  %v2304_v9 = vld [vmem:[#allocation2 + $0x4e8] sm:$0xf] }
  0x91   :  { %1573 = vmatpush.bf16.msra.mxu1 %v1837_v19  ;;  %v2488_v19 = vld [vmem:[#allocation2 + $0x190] sm:$0xf0] }
  0x92   :  { %1586 = vmatpush.bf16.msra.mxu2 %v1933_v22  ;;  %v1968_v22 = vld [vmem:[#allocation2 + $0x248] sm:$0xf]  ;;  %v2620_v11 = vld [vmem:[#allocation2 + $0x5b0] sm:$0xf0] }
  0x93   :  { %1599 = vmatpush.bf16.msra.mxu3 %v2029_v26  ;;  %v2244_v26 = vld [vmem:[#allocation2 + $0x470] sm:$0xf]  ;;  %v1969_v35 = vor.u32 %v2512_v23, %v1968_v22  ;;  %v2617_v23 = vld [vmem:[#allocation2 + $0x598] sm:$0xf0] }
  0x94   :  { %1561 = vmatpush.bf16.msra.mxu0 %v1729_v32  ;;  %v1873_v32 = vor.u32 %v2488_v19, %v1872_v17  ;;  %v2245_v37 = vor.u32 %v2581_v28, %v2244_v26  ;;  %v2569_v17 = vld [vmem:[#allocation2 + $0x418] sm:$0xf0]  ;;  %v2388_v22 = vld [vmem:[#allocation2 + $0x590] sm:$0xf]  ;;  %v2542_v28 = vld [vmem:[#allocation2 + $0x340] sm:$0xf0] }
  0x95   :  { %1574 = vmatpush.bf16.msra.mxu1 %v1825_v33  ;;  %v2436_v33 = vld [vmem:[#allocation2 + $0x5f0] sm:$0xf]  ;;  %v2593_v19 = vld [vmem:[#allocation2 + $0x4d8] sm:$0xf0]  ;;  %v2197_v25 = vor.u32 %v2569_v17, %v2196_v15 }
  0x96   :  { %1587 = vmatpush.bf16.msra.mxu2 %v1921_v34  ;;  %v2629_v34 = vld [vmem:[#allocation2 + $0x5f8] sm:$0xf0] }
  0x97   :  { %1600 = vmatpush.bf16.msra.mxu3 %v2017_v39  ;;  %v2341_v39 = vor.u32 %v2605_v30, %v2340_v29  ;;  %v2437_v46 = vor.u32 %v2629_v34, %v2436_v33  ;;  %v2184_v29 = vld [vmem:[#allocation2 + $0x3f8] sm:$0xf]  ;;  %v2389_v30 = vor.u32 %v2617_v23, %v2388_v22  ;;  %v2590_v33 = vld [vmem:[#allocation2 + $0x4c0] sm:$0xf0] }
  0x98   :  { %1562 = vmatpush.bf16.msra.mxu0 %v1717_v48  ;;  %v2328_v48 = vld [vmem:[#allocation2 + $0x518] sm:$0xf] }
  0x99   :  { %1575 = vmatpush.bf16.msra.mxu1 %v1813_v49  ;;  %v2602_v49 = vld [vmem:[#allocation2 + $0x520] sm:$0xf0]  ;;  %v2376_v34 = vld [vmem:[#allocation2 + $0x578] sm:$0xf] }
  0x9a   :  { %1588 = vmatpush.bf16.msra.mxu2 %v1909_v50  ;;  %v2424_v50 = vld [vmem:[#allocation2 + $0x5d8] sm:$0xf] }
  0x9b   :  { %1601 = vmatpush.bf16.msra.mxu3 %v2005_v54  ;;  %v2329_v54 = vor.u32 %v2602_v49, %v2328_v48  ;;  %v2425_v58 = vor.u32 %v2626_v51, %v2424_v50  ;;  %v2172_v48 = vld [vmem:[#allocation2 + $0x3e0] sm:$0xf]  ;;  %v2563_v51 = vld [vmem:[#allocation2 + $0x3e8] sm:$0xf0] }
  0x9c   :  { %1563 = vmatpush.bf16.msra.mxu0 %v1705_v60  ;;  %v2316_v60 = vld [vmem:[#allocation2 + $0x500] sm:$0xf]  ;;  %v2173_v59 = vor.u32 %v2563_v51, %v2172_v48 }
  0x9d   :  { %1576 = vmatpush.bf16.msra.mxu1 %v1801_v61  ;;  %v2599_v61 = vld [vmem:[#allocation2 + $0x508] sm:$0xf0] }
  0x9e   :  { %1589 = vmatpush.bf16.msra.mxu2 %v1897_v62  ;;  %v2412_v62 = vld [vmem:[#allocation2 + $0x5c0] sm:$0xf] }
  0x9f   :  { %1602 = vmatpush.bf16.msra.mxu3 %v1993_v2  ;;  %v2317_v2 = vor.u32 %v2599_v61, %v2316_v60  ;;  %v2413_v7 = vor.u32 %v2623_v63, %v2412_v62  ;;  %v2064_v61 = vld [vmem:[#allocation2 + $0x308] sm:$0xf]  ;;  %v2536_v62 = vld [vmem:[#allocation2 + $0x310] sm:$0xf0] }
  0xa0   :  { %1564 = vmatpush.bf16.msra.mxu0 %v1693_v10  ;;  %v2400_v10 = vld [vmem:[#allocation2 + $0x5a8] sm:$0xf] }
  0xa1   :  { %1577 = vmatpush.bf16.msra.mxu1 %v1789_v13  ;;  %v2100_v13 = vld [vmem:[#allocation2 + $0x350] sm:$0xf]  ;;  %v2401_v16 = vor.u32 %v2620_v11, %v2400_v10  ;;  %v2160_v63 = vld [vmem:[#allocation2 + $0x3c8] sm:$0xf] }
  0xa2   :  { %1590 = vmatpush.bf16.msra.mxu2 %v1885_v14  ;;  %v2545_v14 = vld [vmem:[#allocation2 + $0x358] sm:$0xf0] }
  0xa3   :  { %1603 = vmatpush.bf16.msra.mxu3 %v1981_v18  ;;  %v2292_v18 = vld [vmem:[#allocation2 + $0x4d0] sm:$0xf]  ;;  %v2101_v24 = vor.u32 %v2545_v14, %v2100_v13 }
  0xa4   :  { %1565 = vmatpush.bf16.msra.mxu0 %v1681_v27  ;;  %v2293_v26 = vor.u32 %v2593_v19, %v2292_v18  ;;  %v2088_v27 = vld [vmem:[#allocation2 + $0x338] sm:$0xf] }
  0xa5   :  { %1578 = vmatpush.bf16.msra.mxu1 %v1777_v31  ;;  %v2566_v31 = vld [vmem:[#allocation2 + $0x400] sm:$0xf0] }
  0xa6   :  { %1591 = vmatpush.bf16.msra.mxu2 %v1873_v32  ;;  %v2280_v32 = vld [vmem:[#allocation2 + $0x4b8] sm:$0xf]  ;;  %v2185_v43 = vor.u32 %v2566_v31, %v2184_v29 }
  0xa7   :  { %1604 = vmatpush.bf16.msra.mxu3 %v1969_v35  ;;  %1566 = vmatmul.bf16.vlgmr.msra.gmra.mxu0 %v2696_v20  ;;  %v2113_v20 = vor.u32 %v2548_v5, %v2112_v3  ;;  %v2614_v35 = vld [vmem:[#allocation2 + $0x580] sm:$0xf0]  ;;  %v2281_v45 = vor.u32 %v2590_v33, %v2280_v32  ;;  %v2584_v3 = vld [vmem:[#allocation2 + $0x490] sm:$0xf0]  ;;  %v2352_v5 = vld [vmem:[#allocation2 + $0x548] sm:$0xf] }
  0xa8   :  { %1610 = vmatpush.bf16.msrb.mxu0 %v2149_v36  ;;  %1579 = vmatmul.bf16.vlgmr.msra.gmra.mxu1 %v2699_v21  ;;  %v1359_v36 = vpop.f32.mrf.mxu0  ;;  %v2377_v50 = vor.u32 %v2614_v35, %v2376_v34 }
  0xa9   :  { %1623 = vmatpush.bf16.msrb.mxu1 %v2245_v37  ;;  %1592 = vmatmul.bf16.vlgmr.msra.gmra.mxu2 %v2688_v4  ;;  %v2208_v4 = vld [vmem:[#allocation2 + $0x428] sm:$0xf]  ;;  %v2089_v37 = vor.u32 %v2542_v28, %v2088_v27  ;;  %v1372_v40 = vpop.f32.mrf.mxu1 }
  0xaa   :  { %1636 = vmatpush.bf16.msrb.mxu2 %v2341_v39  ;;  %1605 = vmatmul.bf16.vlgmr.msra.gmra.mxu3 %v2693_v6  ;;  %v2596_v6 = vld [vmem:[#allocation2 + $0x4f0] sm:$0xf0]  ;;  %v2209_v12 = vor.u32 %v2572_v8, %v2208_v4  ;;  %v2736_v39 = vld [vmem:[%s2756_s2] sm:$0x7] }
  0xab   :  { %1649 = vmatpush.bf16.msrb.mxu3 %v2437_v46  ;;  %v2305_v21 = vor.u32 %v2596_v6, %v2304_v9  ;;  %v2076_v46 = vld [vmem:[#allocation2 + $0x320] sm:$0xf]  ;;  %v292_v57 = vperm.slane %v2736_v39, 0  ;;  %v2608_v4 = vld [vmem:[#allocation2 + $0x550] sm:$0xf0]  ;;  %v2065_v9 = vor.u32 %v2536_v62, %v2064_v61  ;;  %v293_v32 = vperm.slane %v2736_v39, 1 }
  0xac   :  { %1611 = vmatpush.bf16.msrb.mxu0 %v2137_v52  ;;  %v1385_v49 = vpop.f32.mrf.mxu2  ;;  %v2268_v52 = vld [vmem:[#allocation2 + $0x4a0] sm:$0xf]  ;;  %v294_v62 = vperm.slane %v2736_v39, 2 }
  0xad   :  { %1624 = vmatpush.bf16.msrb.mxu1 %v2233_v53  ;;  %v2587_v53 = vld [vmem:[#allocation2 + $0x4a8] sm:$0xf0] }
  0xae   :  { %1637 = vmatpush.bf16.msrb.mxu2 %v2329_v54  ;;  %v1398_v54 = vpop.f32.mrf.mxu3  ;;  %v2269_v60 = vor.u32 %v2587_v53, %v2268_v52 }
  0xaf   :  { %1650 = vmatpush.bf16.msrb.mxu3 %v2425_v58  ;;  %v2077_v58 = vor.u32 %v2539_v47, %v2076_v46 }
  0xb0   :  { %1612 = vmatpush.bf16.msrb.mxu0 %v2125_v0  ;;  %v2365_v0 = vor.u32 %v2611_v56, %v2364_v55  ;;  %v1361_v8 = vpop.f32.mrf.mxu0 }
  0xb1   :  { %1625 = vmatpush.bf16.msrb.mxu1 %v2221_v1  ;;  %v2560_v1 = vld [vmem:[#allocation2 + $0x3d0] sm:$0xf0]  ;;  %v1374_v6 = vpop.f32.mrf.mxu1 }
  0xb2   :  { %1638 = vmatpush.bf16.msrb.mxu2 %v2317_v2  ;;  %v2256_v2 = vld [vmem:[#allocation2 + $0x488] sm:$0xf]  ;;  %v2161_v10 = vor.u32 %v2560_v1, %v2160_v63 }
  0xb3   :  { %1651 = vmatpush.bf16.msrb.mxu3 %v2413_v7  ;;  %v1360_v7 = vadd.f32 %v1359_v36, %v292_v57  ;;  %v2257_v11 = vor.u32 %v2584_v3, %v2256_v2 }
  0xb4   :  { %1613 = vmatpush.bf16.msrb.mxu0 %v2113_v20  ;;  %v1387_v20 = vpop.f32.mrf.mxu2 }
  0xb5   :  { %1626 = vmatpush.bf16.msrb.mxu1 %v2209_v12  ;;  %v2353_v12 = vor.u32 %v2608_v4, %v2352_v5  ;;  %v1373_v13 = vadd.f32 %v1372_v40, %v1360_v7 }
  0xb6   :  { %1639 = vmatpush.bf16.msrb.mxu2 %v2305_v21  ;;  %v1400_v21 = vpop.f32.mrf.mxu3 }
  0xb7   :  { %1652 = vmatpush.bf16.msrb.mxu3 %v2401_v16  ;;  %v1386_v14 = vadd.f32 %v1385_v49, %v1373_v13 }
  0xb8   :  { %1614 = vmatpush.bf16.msrb.mxu0 %v2101_v24 }
  0xb9   :  { %1627 = vmatpush.bf16.msrb.mxu1 %v2197_v25  ;;  %v1399_v15 = vadd.f32 %v1398_v54, %v1386_v14 }
  0xba   :  { %1640 = vmatpush.bf16.msrb.mxu2 %v2293_v26 }
  0xbb   :  { %1653 = vmatpush.bf16.msrb.mxu3 %v2389_v30 }
  0xbc   :  { %1615 = vmatpush.bf16.msrb.mxu0 %v2089_v37 }
  0xbd   :  { %1628 = vmatpush.bf16.msrb.mxu1 %v2185_v43 }
  0xbe   :  { %1641 = vmatpush.bf16.msrb.mxu2 %v2281_v45 }
  0xbf   :  { %1654 = vmatpush.bf16.msrb.mxu3 %v2377_v50 }
  0xc0   :  { %1616 = vmatpush.bf16.msrb.mxu0 %v2077_v58 }
  0xc1   :  { %1629 = vmatpush.bf16.msrb.mxu1 %v2173_v59 }
  0xc2   :  { %1642 = vmatpush.bf16.msrb.mxu2 %v2269_v60 }
  0xc3   :  { %1655 = vmatpush.bf16.msrb.mxu3 %v2365_v0 }
  0xc4   :  { %1617 = vmatpush.bf16.msrb.mxu0 %v2065_v9  ;;  %v1411_v16 = vpop.f32.mrf.mxu0 }
  0xc5   :  { %1630 = vmatpush.bf16.msrb.mxu1 %v2161_v10  ;;  %v1412_v17 = vadd.f32 %v1411_v16, %v1399_v15  ;;  %v1424_v18 = vpop.f32.mrf.mxu1 }
  0xc6   :  { %1643 = vmatpush.bf16.msrb.mxu2 %v2257_v11 }
  0xc7   :  { %1656 = vmatpush.bf16.msrb.mxu3 %v2353_v12  ;;  %1618 = vmatmul.bf16.vlgmr.msrb.gmra.mxu0 %v2711_v41  ;;  %v1425_v19 = vadd.f32 %v1424_v18, %v1412_v17 }
  0xc8   :  { %1631 = vmatmul.bf16.vlgmr.msrb.gmra.mxu1 %v2715_v44 }
  0xc9   :  { %1644 = vmatmul.bf16.vlgmr.msrb.gmra.mxu2 %v2709_v38 }
  0xca   :  { %1657 = vmatmul.bf16.vlgmr.msrb.gmra.mxu3 %v2713_v42 }
  0xcc   :  { %v1437_v22 = vpop.f32.mrf.mxu2  ;;  %v1413_v26 = vpop.f32.mrf.mxu0 }
  0xcd   :  { %v1438_v23 = vadd.f32 %v1437_v22, %v1425_v19  ;;  %v1450_v24 = vpop.f32.mrf.mxu3  ;;  %v1426_v27 = vpop.f32.mrf.mxu1 }
  0xcf   :  { %v1451_v25 = vadd.f32 %v1450_v24, %v1438_v23 }
  0xd1   :  { %1662 = vst [vmem:[%s2757_s3] sm:$0xff] %v1451_v25 }
  0xd4   :  { %v1439_v41 = vpop.f32.mrf.mxu2 }
  0xd5   :  { %v1452_v44 = vpop.f32.mrf.mxu3 }
  0xe4   :  { %v1463_v38 = vpop.f32.mrf.mxu0 }
  0xe5   :  { %v1476_v28 = vpop.f32.mrf.mxu1  ;;  %v1464_v35 = vadd.f32 %v1463_v38, %v293_v32 }
  0xe7   :  { %v1477_v36 = vadd.f32 %v1476_v28, %v1464_v35 }
  0xec   :  { %v1489_v42 = vpop.f32.mrf.mxu2  ;;  %v1465_v30 = vpop.f32.mrf.mxu0 }
  0xed   :  { %v1502_v29 = vpop.f32.mrf.mxu3  ;;  %v1478_v31 = vpop.f32.mrf.mxu1  ;;  %v1490_v37 = vadd.f32 %v1489_v42, %v1477_v36 }
  0xef   :  { %v1503_v40 = vadd.f32 %v1502_v29, %v1490_v37 }
  0xf4   :  { %v1491_v33 = vpop.f32.mrf.mxu2 }
  0xf5   :  { %v1504_v34 = vpop.f32.mrf.mxu3 }
 0x104   :  { %v1515_v43 = vpop.f32.mrf.mxu0 }
 0x105   :  { %v1516_v45 = vadd.f32 %v1515_v43, %v1503_v40  ;;  %v1528_v46 = vpop.f32.mrf.mxu1 }
 0x107   :  { %v1529_v47 = vadd.f32 %v1528_v46, %v1516_v45 }
 0x10c   :  { %v1541_v48 = vpop.f32.mrf.mxu2  ;;  %v1517_v52 = vpop.f32.mrf.mxu0 }
 0x10d   :  { %v1542_v49 = vadd.f32 %v1541_v48, %v1529_v47  ;;  %v1554_v50 = vpop.f32.mrf.mxu3  ;;  %v1530_v53 = vpop.f32.mrf.mxu1 }
 0x10f   :  { %v1555_v51 = vadd.f32 %v1554_v50, %v1542_v49 }
 0x111   :  { %1663 = vst [vmem:[%s2757_s3 + $0x8] sm:$0xff] %v1555_v51 }
 0x114   :  { %v1543_v54 = vpop.f32.mrf.mxu2 }
 0x115   :  { %v1556_v55 = vpop.f32.mrf.mxu3 }
 0x124   :  { %v1567_v56 = vpop.f32.mrf.mxu0 }
 0x125   :  { %v1580_v57 = vpop.f32.mrf.mxu1  ;;  %v1568_v1 = vadd.f32 %v1567_v56, %v294_v62 }
 0x127   :  { %v1581_v2 = vadd.f32 %v1580_v57, %v1568_v1 }
 0x12c   :  { %v1593_v58 = vpop.f32.mrf.mxu2  ;;  %v1569_v60 = vpop.f32.mrf.mxu0 }
 0x12d   :  { %v1606_v59 = vpop.f32.mrf.mxu3  ;;  %v1582_v61 = vpop.f32.mrf.mxu1  ;;  %v1594_v3 = vadd.f32 %v1593_v58, %v1581_v2 }
 0x12f   :  { %v1607_v5 = vadd.f32 %v1606_v59, %v1594_v3 }
 0x134   :  { %v1595_v63 = vpop.f32.mrf.mxu2 }
 0x135   :  { %v1608_v0 = vpop.f32.mrf.mxu3 }
 0x144   :  { %v1619_v4 = vpop.f32.mrf.mxu0 }
 0x145   :  { %v1632_v7 = vpop.f32.mrf.mxu1  ;;  %v1620_v8 = vadd.f32 %v1619_v4, %v1607_v5 }
 0x147   :  { %v1633_v9 = vadd.f32 %v1632_v7, %v1620_v8 }
 0x14c   :  { %v1645_v6 = vpop.f32.mrf.mxu2  ;;  %v1621_v20 = vpop.f32.mrf.mxu0 }
 0x14d   :  { %v1646_v10 = vadd.f32 %v1645_v6, %v1633_v9  ;;  %v1658_v11 = vpop.f32.mrf.mxu3  ;;  %v1634_v12 = vpop.f32.mrf.mxu1 }
 0x14f   :  { %v1659_v21 = vadd.f32 %v1658_v11, %v1646_v10 }
 0x151   :  { %1664 = vst [vmem:[%s2757_s3 + $0x10] sm:$0xff] %v1659_v21 }
 0x154   :  { %v1647_v39 = vpop.f32.mrf.mxu2 }
 0x155   :  { %v1660_v13 = vpop.f32.mrf.mxu3 }
 0x156   :  { %1669 = vsyncpa [#allocation3], 1 }

</bundles_post_ra>
